<compile_context>
chip_gen: v7x
topology: tpu7x:2x2x1
jax: 0.10.0
libtpu: 0.0.40
codegen_flags: <defaults>
</compile_context>

<pallas_src>
import functools
import math

import jax
import jax.numpy as jnp
from jax.experimental import pallas as pl
from jax.experimental.pallas import tpu as pltpu


# ----------------------------------------------------------------------------
# helpers
# ----------------------------------------------------------------------------
def _pick_tile(dim, candidates):
    """Largest candidate that evenly divides `dim`; else the full dim."""
    for c in candidates:
        if c <= dim and dim % c == 0:
            return c
    return dim


_VMEM_LIMIT = 48 * 1024 * 1024  # fits v7x (64 MiB physical) with headroom


# ----------------------------------------------------------------------------
# dense: y = act(x @ w + b), tiled (tm, K) x (K, tn) -> (tm, tn), bf16 MXU
# ----------------------------------------------------------------------------
def _dense_kernel(x_ref, w_ref, b_ref, o_ref, *, activation):
    x = x_ref[...].astype(jnp.bfloat16)
    w = w_ref[...].astype(jnp.bfloat16)
    y = jnp.dot(x, w, preferred_element_type=jnp.float32)
    y = y + b_ref[...]                      # (1, tn) broadcasts over rows, f32
    if activation == "gelu":
        # TODO(synk): HF BERT uses exact erf-based GELU; tanh approximation used here.
        y = 0.5 * y * (1.0 + jnp.tanh(0.7978845608028654 * (y + 0.044715 * y * y * y)))
    o_ref[...] = y.astype(o_ref.dtype)


def dense(x, w, b, activation=None, out_dtype=jnp.float32):
    M, K = x.shape
    N = w.shape[1]
    tm = _pick_tile(M, (256, 128, 64, 32, 16, 8))   # tm<=256 keeps v7x VMEM happy
    tn = _pick_tile(N, (512, 384, 256, 128))        # multiples of 128 or full N
    return pl.pallas_call(
        functools.partial(_dense_kernel, activation=activation),
        out_shape=jax.ShapeDtypeStruct((M, N), out_dtype),
        grid=(M // tm, N // tn),
        in_specs=[
            pl.BlockSpec((tm, K), lambda i, j: (i, 0)),   # activations pinned over j
            pl.BlockSpec((K, tn), lambda i, j: (0, j)),   # weights streamed
            pl.BlockSpec((1, tn), lambda i, j: (0, j)),
        ],
        out_specs=pl.BlockSpec((tm, tn), lambda i, j: (i, j)),
        compiler_params=pltpu.CompilerParams(
            dimension_semantics=("parallel", "parallel"),
            vmem_limit_bytes=_VMEM_LIMIT),
    )(x, w, b.reshape(1, N))


# ----------------------------------------------------------------------------
# layernorm (optionally with fused residual add), row-tiled
# ----------------------------------------------------------------------------
def _ln_body(x, g, b, eps):
    mu = jnp.mean(x, axis=-1, keepdims=True)
    var = jnp.mean((x - mu) * (x - mu), axis=-1, keepdims=True)
    return (x - mu) * jax.lax.rsqrt(var + eps) * g + b


def _ln_kernel(x_ref, g_ref, b_ref, o_ref, *, eps):
    o_ref[...] = _ln_body(x_ref[...], g_ref[...], b_ref[...], eps)


def _ln_res_kernel(x_ref, r_ref, g_ref, b_ref, o_ref, *, eps):
    o_ref[...] = _ln_body(x_ref[...] + r_ref[...], g_ref[...], b_ref[...], eps)


def layernorm(x, gamma, beta, residual=None, eps=1e-12):
    M, H = x.shape
    tm = _pick_tile(M, (1024, 512, 256, 128, 64, 32, 16, 8))
    row_spec = pl.BlockSpec((tm, H), lambda i: (i, 0))
    vec_spec = pl.BlockSpec((1, H), lambda i: (0, 0))
    args = [x] if residual is None else [x, residual]
    kern = _ln_kernel if residual is None else _ln_res_kernel
    return pl.pallas_call(
        functools.partial(kern, eps=eps),
        out_shape=jax.ShapeDtypeStruct((M, H), jnp.float32),
        grid=(M // tm,),
        in_specs=[row_spec] * len(args) + [vec_spec, vec_spec],
        out_specs=row_spec,
        compiler_params=pltpu.CompilerParams(
            dimension_semantics=("parallel",),
            vmem_limit_bytes=_VMEM_LIMIT),
    )(*args, gamma.reshape(1, H), beta.reshape(1, H))


# ----------------------------------------------------------------------------
# attention over head-groups: grid = (batch, head_group), blocks (1, S, hpb*dh)
# q/k/v/out stay in (B, S, H) layout -> no JAX-side head transposes.
# ----------------------------------------------------------------------------
def _attn_kernel(q_ref, k_ref, v_ref, m_ref, o_ref, *, hpb, dh, scale):
    qb = q_ref[0] * scale          # (S, hpb*dh) bf16; scale folded into q (O(S*dh))
    kb = k_ref[0]
    vb = v_ref[0]
    m = m_ref[0]                   # (1, S) additive mask, f32
    outs = []
    for h in range(hpb):           # static unroll; hpb is small (2 for BERT-base)
        lo, hi = h * dh, (h + 1) * dh
        q = qb[:, lo:hi]
        k = kb[:, lo:hi]
        v = vb[:, lo:hi]
        s = jnp.dot(q, k.T, preferred_element_type=jnp.float32) + m      # (S, S) f32
        s = s - jnp.max(s, axis=-1, keepdims=True)
        p = jnp.exp(s)
        p = p * pl.reciprocal(jnp.sum(p, axis=-1, keepdims=True), approx=True)
        outs.append(jnp.dot(p.astype(vb.dtype), v, preferred_element_type=jnp.float32))
    o_ref[0] = jnp.concatenate(outs, axis=-1).astype(o_ref.dtype)        # lane-dense store


def attention(q, k, v, mask_bias, *, heads, head_dim, scale):
    B, S, H = q.shape
    hpb = min(heads, max(1, 128 // head_dim))   # aim for 128-wide lane blocks
    while heads % hpb:
        hpb -= 1
    blk = hpb * head_dim
    n_groups = heads // hpb
    qkv_spec = pl.BlockSpec((1, S, blk), lambda b, g: (b, 0, g))
    return pl.pallas_call(
        functools.partial(_attn_kernel, hpb=hpb, dh=head_dim, scale=scale),
        out_shape=jax.ShapeDtypeStruct((B, S, H), jnp.bfloat16),
        grid=(B, n_groups),
        in_specs=[
            qkv_spec, qkv_spec, qkv_spec,
            pl.BlockSpec((1, 1, S), lambda b, g: (b, 0, 0)),   # (B,1,S) mask, no nH replication
        ],
        out_specs=pl.BlockSpec((1, S, blk), lambda b, g: (b, 0, g)),
        compiler_params=pltpu.CompilerParams(
            dimension_semantics=("parallel", "parallel"),
            vmem_limit_bytes=_VMEM_LIMIT),
    )(q, k, v, mask_bias)


# ----------------------------------------------------------------------------
# Parameter construction (deterministic, synthetic — no checkpoint load)
# ----------------------------------------------------------------------------
def make_params(key, *, vocab, max_pos, hidden, heads, intermediate, layers, labels):
    def nrm(k, shape):
        return (jax.random.normal(k, shape, jnp.float32) * 0.02).astype(jnp.float32)

    keys = jax.random.split(key, 4 + layers)
    params = {
        "num_heads": heads,
        "word_emb": nrm(keys[0], (vocab, hidden)),
        "pos_emb": nrm(keys[1], (max_pos, hidden)),
        "type_emb": nrm(keys[2], (2, hidden)),
        "emb_ln_g": jnp.ones((hidden,), jnp.float32),
        "emb_ln_b": jnp.zeros((hidden,), jnp.float32),
        "cls_w": nrm(keys[3], (hidden, labels)),
        "cls_b": jnp.zeros((labels,), jnp.float32),
        "layers": [],
    }
    for li in range(layers):
        lk = jax.random.split(keys[4 + li], 6)
        params["layers"].append({
            "q_w": nrm(lk[0], (hidden, hidden)), "q_b": jnp.zeros((hidden,), jnp.float32),
            "k_w": nrm(lk[1], (hidden, hidden)), "k_b": jnp.zeros((hidden,), jnp.float32),
            "v_w": nrm(lk[2], (hidden, hidden)), "v_b": jnp.zeros((hidden,), jnp.float32),
            "o_w": nrm(lk[3], (hidden, hidden)), "o_b": jnp.zeros((hidden,), jnp.float32),
            "ln1_g": jnp.ones((hidden,), jnp.float32), "ln1_b": jnp.zeros((hidden,), jnp.float32),
            "i_w": nrm(lk[4], (hidden, intermediate)), "i_b": jnp.zeros((intermediate,), jnp.float32),
            "f_w": nrm(lk[5], (intermediate, hidden)), "f_b": jnp.zeros((hidden,), jnp.float32),
            "ln2_g": jnp.ones((hidden,), jnp.float32), "ln2_b": jnp.zeros((hidden,), jnp.float32),
        })
    return params


# ----------------------------------------------------------------------------
# Forward pass (BERT encoder + token-classification head, eval mode / no dropout)
# ----------------------------------------------------------------------------
def qa_span_detector_forward(params, input_ids, attention_mask):
    B, S = input_ids.shape
    H = params["word_emb"].shape[1]
    nH = params["num_heads"]
    dh = H // nH
    M = B * S
    scale = 1.0 / math.sqrt(dh)

    # Embeddings (gather is glue; token_type_ids assumed all-zero as HF default)
    x = (params["word_emb"][input_ids]
         + params["pos_emb"][:S][None, :, :]
         + params["type_emb"][0][None, None, :])          # (B, S, H)
    x = layernorm(x.reshape(M, H), params["emb_ln_g"], params["emb_ln_b"])

    # Additive attention-mask bias, kept un-replicated at (B, 1, S)
    mask_bias = ((1.0 - attention_mask.astype(jnp.float32)) * -10000.0).reshape(B, 1, S)

    for layer in params["layers"]:
        # fused QKV projection: one (H, 3H) matmul, bf16 output
        w_qkv = jnp.concatenate([layer["q_w"], layer["k_w"], layer["v_w"]], axis=1)
        b_qkv = jnp.concatenate([layer["q_b"], layer["k_b"], layer["v_b"]], axis=0)
        qkv = dense(x, w_qkv, b_qkv, out_dtype=jnp.bfloat16)            # (M, 3H)
        q, k, v = jnp.split(qkv.reshape(B, S, 3 * H), 3, axis=-1)       # (B, S, H) each

        ctx = attention(q, k, v, mask_bias, heads=nH, head_dim=dh, scale=scale)  # (B, S, H) bf16
        attn_out = dense(ctx.reshape(M, H), layer["o_w"], layer["o_b"])          # (M, H) f32
        x = layernorm(attn_out, layer["ln1_g"], layer["ln1_b"], residual=x)      # fused residual+LN

        h = dense(x, layer["i_w"], layer["i_b"], activation="gelu",
                  out_dtype=jnp.bfloat16)                                        # bf16 intermediate
        h = dense(h, layer["f_w"], layer["f_b"])                                 # (M, H) f32
        x = layernorm(h, layer["ln2_g"], layer["ln2_b"], residual=x)             # fused residual+LN

    # num_labels=2 head: lane width 2 would force masked partial stores -> plain JAX
    logits = x @ params["cls_w"] + params["cls_b"]                               # (M, 2)
    return logits.reshape(B, S, -1)


# ----------------------------------------------------------------------------
if __name__ == "__main__":
    # Small, BERT-shaped config (hidden=32, heads=2, intermediate=64, layers=2)
    B, S = 2, 8
    VOCAB, MAX_POS, HIDDEN, HEADS, INTER, LAYERS, LABELS = 100, 16, 32, 2, 64, 2, 2

    key = jax.random.PRNGKey(0)
    pkey, ikey = jax.random.split(key)
    params = make_params(pkey, vocab=VOCAB, max_pos=MAX_POS, hidden=HIDDEN,
                         heads=HEADS, intermediate=INTER, layers=LAYERS,
                         labels=LABELS)

    input_ids = jax.random.randint(ikey, (B, S), 0, VOCAB, dtype=jnp.int32)
    attention_mask = jnp.ones((B, S), dtype=jnp.int32).at[1, S - 2:].set(0)  # pad tail of seq 1

    logits = qa_span_detector_forward(params, input_ids, attention_mask)
    logits = jax.block_until_ready(logits)

    assert logits.shape == (B, S, LABELS)
    assert bool(jnp.all(jnp.isfinite(logits)))
    print("KERNEL_OK")
</pallas_src>

<mosaic_0001>
module attributes {stable_mosaic.version = 11 : i64} {
  func.func @_ln_kernel(%arg0: i32, %arg1: memref<16x32xf32, #tpu.memory_space<vmem>>, %arg2: memref<1x32xf32, #tpu.memory_space<vmem>>, %arg3: memref<1x32xf32, #tpu.memory_space<vmem>>, %arg4: memref<16x32xf32, #tpu.memory_space<vmem>>) attributes {dimension_semantics = [#tpu.dimension_semantics<parallel>], iteration_bounds = array<i64: 1>, scalar_prefetch = 0 : i64, scratch_operands = 0 : i64, tpu.core_type = #tpu.core_type<tc>, window_params = [{transform_indices = @transform_0, window_bounds = array<i64: 16, 32>}, {pipeline_mode = #tpu.pipeline_mode<synchronous>, transform_indices = @transform_1, window_bounds = array<i64: 1, 32>}, {pipeline_mode = #tpu.pipeline_mode<synchronous>, transform_indices = @transform_2, window_bounds = array<i64: 1, 32>}, {transform_indices = @transform_3, window_bounds = array<i64: 16, 32>}]} {
    %c0 = arith.constant 0 : index
    %c0_0 = arith.constant 0 : index
    %0 = vector.load %arg1[%c0, %c0_0] : memref<16x32xf32, #tpu.memory_space<vmem>>, vector<16x32xf32>
    %c0_1 = arith.constant 0 : index
    %c0_2 = arith.constant 0 : index
    %1 = vector.load %arg2[%c0_1, %c0_2] : memref<1x32xf32, #tpu.memory_space<vmem>>, vector<1x32xf32>
    %c0_3 = arith.constant 0 : index
    %c0_4 = arith.constant 0 : index
    %2 = vector.load %arg3[%c0_3, %c0_4] : memref<1x32xf32, #tpu.memory_space<vmem>>, vector<1x32xf32>
    %cst = arith.constant dense<0.000000e+00> : vector<16xf32>
    %3 = vector.multi_reduction <add>, %0, %cst [1] : vector<16x32xf32> to vector<16xf32>
    %4 = vector.shape_cast %3 : vector<16xf32> to vector<16x1xf32>
    %cst_5 = arith.constant 3.200000e+01 : f32
    %5 = vector.broadcast %cst_5 : f32 to vector<16x1xf32>
    %6 = arith.divf %4, %5 : vector<16x1xf32>
    %7 = vector.broadcast %6 : vector<16x1xf32> to vector<16x32xf32>
    %8 = arith.subf %0, %7 : vector<16x32xf32>
    %9 = vector.broadcast %6 : vector<16x1xf32> to vector<16x32xf32>
    %10 = arith.subf %0, %9 : vector<16x32xf32>
    %11 = arith.mulf %8, %10 : vector<16x32xf32>
    %cst_6 = arith.constant dense<0.000000e+00> : vector<16xf32>
    %12 = vector.multi_reduction <add>, %11, %cst_6 [1] : vector<16x32xf32> to vector<16xf32>
    %13 = vector.shape_cast %12 : vector<16xf32> to vector<16x1xf32>
    %cst_7 = arith.constant 3.200000e+01 : f32
    %14 = vector.broadcast %cst_7 : f32 to vector<16x1xf32>
    %15 = arith.divf %13, %14 : vector<16x1xf32>
    %16 = vector.broadcast %6 : vector<16x1xf32> to vector<16x32xf32>
    %17 = arith.subf %0, %16 : vector<16x32xf32>
    %cst_8 = arith.constant 9.99999996E-13 : f32
    %18 = vector.broadcast %cst_8 : f32 to vector<16x1xf32>
    %19 = arith.addf %15, %18 : vector<16x1xf32>
    %20 = math.rsqrt %19 : vector<16x1xf32>
    %21 = vector.broadcast %20 : vector<16x1xf32> to vector<16x32xf32>
    %22 = arith.mulf %17, %21 : vector<16x32xf32>
    %23 = vector.broadcast %1 : vector<1x32xf32> to vector<16x32xf32>
    %24 = arith.mulf %22, %23 : vector<16x32xf32>
    %25 = vector.broadcast %2 : vector<1x32xf32> to vector<16x32xf32>
    %26 = arith.addf %24, %25 : vector<16x32xf32>
    %c0_9 = arith.constant 0 : index
    %c0_10 = arith.constant 0 : index
    %27 = vector.load %arg4[%c0_9, %c0_10] : memref<16x32xf32, #tpu.memory_space<vmem>>, vector<16x32xf32>
    tpu.vector_store %arg4[%c0_9, %c0_10], %26 {strides = array<i32>} : memref<16x32xf32, #tpu.memory_space<vmem>>, vector<16x32xf32>,
    return
  }
  func.func @transform_0(%arg0: i32) -> (i32, i32) {
    %c0_i32 = arith.constant 0 : i32
    %c0_i32_0 = arith.constant 0 : i32
    return %arg0, %c0_i32 : i32, i32
  }
  func.func @transform_1(%arg0: i32) -> (i32, i32) {
    %c0_i32 = arith.constant 0 : i32
    %c0_i32_0 = arith.constant 0 : i32
    %c0_i32_1 = arith.constant 0 : i32
    return %c0_i32, %c0_i32_0 : i32, i32
  }
  func.func @transform_2(%arg0: i32) -> (i32, i32) {
    %c0_i32 = arith.constant 0 : i32
    %c0_i32_0 = arith.constant 0 : i32
    %c0_i32_1 = arith.constant 0 : i32
    return %c0_i32, %c0_i32_0 : i32, i32
  }
  func.func @transform_3(%arg0: i32) -> (i32, i32) {
    %c0_i32 = arith.constant 0 : i32
    %c0_i32_0 = arith.constant 0 : i32
    return %arg0, %c0_i32 : i32, i32
  }
}

</mosaic_0001>

<bundles_post_ra>
// kernel: tpu_custom_call.1
= control target key start
LH: loop header
LB: loop body
LE: loop exit
PB: predicated region body
PF: predicated region fallthrough
CT: control target
= control target key end

     0   :  { %8 = vsyncpa [#allocation3], 0  ;;  %s220_s0 = inlined_call_operand.hbm [shape: f32[16,32], index: 0, kind: input, shape index: {}]   ;;  %s221_s1 = inlined_call_operand.vmem [shape: f32[1,32], index: 1, kind: input, shape index: {}]   ;;  %s222_s2 = inlined_call_operand.vmem [shape: f32[1,32], index: 2, kind: input, shape index: {}]   ;;  %s223_s3 = inlined_call_operand.hbm [shape: f32[16,32], index: 3, kind: output, shape index: {}]  }
   0x1   :  { %9 = vsyncpa [#allocation4], 0  ;;  %s154_s12 = smov [#allocation2]   ;;  %s106_s16 = scalar_lea.hbm %s220_s0, 256 }
   0x2   :  { %s15_s13 = sshll.u32 %s154_s12, 4  ;;  %p107_p0 = scmp.ne.s32.totalorder %s220_s0, %s106_s16  ;;  %s16_s13 = int_to_ptr.vmem [resolvable:$true] %s15_s13 }
   0x3   :  { %p110_p1 = scmp.lt.u32.totalorder %s106_s16, %s220_s0 }
   0x5   :  { %p112_p2 = pnand %p110_p1, %p107_p0 }
   0x7   :  { %115 = shalt.err (!%p112_p2)
}
   0x8   :  { %s116_s21 = scalar_lea.vmem %s16_s13, 256  ;;  %p121_p4 = scmp.lt.s32.totalorder %s16_s13, %s16_s13 }
   0x9   :  { %p117_p3 = scmp.ne.s32.totalorder %s16_s13, %s116_s21  ;;  %p122_p5 = scmp.lt.s32.totalorder %s116_s21, %s116_s21 }
   0xb   :  { %p123_p6 = por %p122_p5, %p121_p4 }
   0xd   :  { %p124_p7 = pnand %p123_p6, %p117_p3 }
   0xf   :  { %127 = shalt.err (!%p124_p7)
}
  0x10   :  { %s155_s22 = smov 128   ;;  %s156_s23 = smov 8  }
  0x11   :  { %21 = dma.hbm_to_vmem [thread:$0]  %s220_s0, 256, %s16_s13, [#allocation3], %s155_s22, %s155_s22, %s156_s23  }
  0x12   :  { %150 = dma.done.wait [#allocation3], 256  }
  0x13   :  { %151 = vsyncadd [#allocation3], 4294967040  ;;  %vm33_vm0 = vcmask 261120   ;;  %v29_v0 = vld [vmem:[#allocation2] sm:$0xff]  ;;  %v30_v1 = vld [vmem:[#allocation2 + $0x8] sm:$0xff]  ;;  %s157_s29 = smov [#allocation5]  }
  0x14   :  { %v34_v2 = vsel %vm33_vm0, %v29_v0, 0.0  ;;  %v37_v3 = vsel %vm33_vm0, %v30_v1, 0.0  ;;  %v96_v21 = vld [vmem:[%s221_s1] ss:$0 sm:$0xff]  ;;  %s84_s30 = sshll.u32 %s157_s29, 4  ;;  %s85_s30 = int_to_ptr.vmem [resolvable:$true] %s84_s30 }
  0x15   :  { %35 = vadd.xlane.f32.xlu0 %v34_v2  ;;  %v97_v23 = vld [vmem:[%s222_s2] ss:$0 sm:$0xff]  ;;  %s128_s4 = scalar_lea.vmem %s85_s30, 256  ;;  %p133_p9 = scmp.lt.s32.totalorder %s85_s30, %s85_s30 }
  0x16   :  { %p129_p8 = scmp.ne.s32.totalorder %s85_s30, %s128_s4  ;;  %p134_p10 = scmp.lt.s32.totalorder %s128_s4, %s128_s4 }
  0x18   :  { %p135_p11 = por %p134_p10, %p133_p9 }
  0x19   :  { %38 = vadd.xlane.f32.xlu0 %v37_v3 }
  0x1a   :  { %p136_p12 = pnand %p135_p11, %p129_p8 }
  0xa2   :  { %v36_v4 = vpop.xlane.xlu0 %35 }
  0xa3   :  { %v41_v5 = vmul.f32 0.03125, %v36_v4 }
  0xa5   :  { %v43_v6 = vsub.f32 %v29_v0, %v41_v5 }
  0xa6   :  { %v39_v7 = vpop.xlane.xlu0 %38 }
  0xa7   :  { %v42_v8 = vmul.f32 0.03125, %v39_v7  ;;  %v45_v9 = vmul.f32 %v43_v6, %v43_v6 }
  0xa9   :  { %v44_v10 = vsub.f32 %v30_v1, %v42_v8  ;;  %v47_v11 = vsel %vm33_vm0, %v45_v9, 0.0 }
  0xaa   :  { %48 = vadd.xlane.f32.xlu1 %v47_v11 }
  0xab   :  { %v46_v12 = vmul.f32 %v44_v10, %v44_v10 }
  0xad   :  { %v50_v13 = vsel %vm33_vm0, %v46_v12, 0.0 }
  0xae   :  { %51 = vadd.xlane.f32.xlu1 %v50_v13 }
 0x137   :  { %v49_v14 = vpop.xlane.xlu1 %48 }
 0x138   :  { %v53_v15 = vmul.f32 0.03125, %v49_v14 }
 0x13a   :  { %v55_v16 = vadd.f32 1e-12, %v53_v15 }
 0x13b   :  { %v52_v17 = vpop.xlane.xlu1 %51 }
 0x13c   :  { %102 = vrsqrt.f32 %v55_v16  ;;  %v54_v18 = vmul.f32 0.03125, %v52_v17 }
 0x13e   :  { %v56_v19 = vadd.f32 1e-12, %v54_v18 }
 0x140   :  { %104 = vrsqrt.f32 %v56_v19 }
 0x146   :  { %v103_v20 = vpop.eup %102 }
 0x147   :  { %v59_v22 = vmul.f32 %v103_v20, %v43_v6 }
 0x149   :  { %v67_v24 = vmul.f32 %v96_v21, %v59_v22 }
 0x14a   :  { %v105_v25 = vpop.eup %104 }
 0x14b   :  { %v60_v26 = vmul.f32 %v105_v25, %v44_v10  ;;  %v75_v27 = vadd.f32 %v97_v23, %v67_v24 }
 0x14d   :  { %v68_v28 = vmul.f32 %v96_v21, %v60_v26  ;;  %77 = vst.msk [vmem:[#allocation5] sm:$0xff] %vm33_vm0, %v75_v27 }
 0x14f   :  { %v76_v29 = vadd.f32 %v97_v23, %v68_v28 }
 0x151   :  { %78 = vst.msk [vmem:[#allocation5 + $0x8] sm:$0xff] %vm33_vm0, %v76_v29 }
 0x152   :  { %139 = shalt.err (!%p136_p12)
}
 0x153   :  { %s140_s5 = scalar_lea.hbm %s223_s3, 256 }
 0x154   :  { %p141_p13 = scmp.ne.s32.totalorder %s223_s3, %s140_s5  ;;  %p144_p0 = scmp.lt.u32.totalorder %s140_s5, %s223_s3 }
 0x156   :  { %p146_p1 = pnand %p144_p0, %p141_p13 }
 0x158   :  { %149 = shalt.err (!%p146_p1)
}
 0x159   :  { %90 = dma.vmem_to_hbm [thread:$0]  %s85_s30, 256, %s223_s3, [#allocation4], %s155_s22, %s155_s22, %s156_s23  }
 0x15a   :  { %152 = dma.done.wait [#allocation4], 256  }
 0x15b   :  { %153 = vsyncadd [#allocation4], 4294967040 }
 0x15c   :  { %94 = vsyncpa [#allocation3], 1 }
 0x15d   :  { %95 = vsyncpa [#allocation4], 1 }

</bundles_post_ra>
